<compile_context>
chip_gen: v6e
topology: v6e:2x2x1
jax: 0.10.0
libtpu: 0.0.40
codegen_flags: <defaults>
</compile_context>

<pallas_src>
import functools

import numpy as np

import jax
import jax.numpy as jnp
from jax.experimental import pallas as pl
from jax.experimental.pallas import tpu as pltpu


def _round_up(n, m):
    return (n + m - 1) // m * m


def _layer_norm(x, gamma, beta, eps=1e-5):
    # Single data sweep: var = E[x^2] - mu^2 (two independent lane reductions).
    mu = jnp.mean(x, axis=-1, keepdims=True)
    ms = jnp.mean(x * x, axis=-1, keepdims=True)
    var = ms - mu * mu
    return (x - mu) * jax.lax.rsqrt(var + eps) * gamma + beta


def ctx_kernel(x_ref, w1_ref, w2_ref, p1_ref, p2_ref, o_ref, *,
               act_on_last_layer):
    x = x_ref[...].astype(jnp.float32)               # (tm, K) residual copy, f32

    p1 = p1_ref[...]                                 # (3, H) f32: [b1, gamma1, beta1]
    p2 = p2_ref[...]                                 # (3, K) f32: [b2, gamma2, beta2]

    # sfcjoin1 (bf16 MXU operands, f32 accumulation) -> activation1 (ReLU)
    # -> spatial_norm1 -> d1 (identity in eval)
    h = jnp.dot(x.astype(jnp.bfloat16), w1_ref[...],
                preferred_element_type=jnp.float32) + p1[0:1, :]
    h = jnp.maximum(h, 0.0)
    h = _layer_norm(h, p1[1:2, :], p1[2:3, :])

    # sfcjoin2
    y = jnp.dot(h.astype(jnp.bfloat16), w2_ref[...],
                preferred_element_type=jnp.float32) + p2[0:1, :]

    if act_on_last_layer:
        # activation2 -> spatial_norm2 -> d2 (identity) -> residual
        y = jnp.maximum(y, 0.0)
        y = _layer_norm(y, p2[1:2, :], p2[2:3, :])
        y = y + x

    o_ref[...] = y.astype(o_ref.dtype)


def _run_rows(z, params, *, act_on_last_layer, tm):
    """Run do_forward() on a (rows, kps_dim) array (single fused pallas_call)."""
    M, K = z.shape
    H = params["w1"].shape[1]

    # Large row tiles amortize per-step overhead; clamp for small inputs and
    # cap at 2048 to stay friendly to v7x's 64 MiB VMEM.
    tm = max(8, min(int(tm), 2048))
    tm = min(tm, _round_up(M, 8))
    Mp = _round_up(M, tm)
    if Mp != M:
        z = jnp.pad(z, ((0, Mp - M), (0, 0)))        # zero rows are harmless (eps>0)

    # bf16 weights: halves weight DMA bytes and hits the MXU's native bf16 rate.
    w1 = params["w1"].astype(jnp.bfloat16)
    w2 = params["w2"].astype(jnp.bfloat16)
    # Pack per-feature vectors: one DMA each instead of six.
    p1 = jnp.stack([params["b1"], params["g1"], params["be1"]]).astype(jnp.float32)
    p2 = jnp.stack([params["b2"], params["g2"], params["be2"]]).astype(jnp.float32)

    kern = functools.partial(ctx_kernel, act_on_last_layer=act_on_last_layer)
    full = lambda i: (0, 0)

    out = pl.pallas_call(
        kern,
        out_shape=jax.ShapeDtypeStruct((Mp, K), z.dtype),
        grid_spec=pltpu.PrefetchScalarGridSpec(
            num_scalar_prefetch=0,
            grid=(Mp // tm,),
            in_specs=[
                pl.BlockSpec((tm, K), lambda i: (i, 0)),   # x rows
                pl.BlockSpec((K, H), full),                # W1 (bf16)
                pl.BlockSpec((H, K), full),                # W2 (bf16)
                pl.BlockSpec((3, H), full),                # [b1, gamma1, beta1]
                pl.BlockSpec((3, K), full),                # [b2, gamma2, beta2]
            ],
            out_specs=pl.BlockSpec((tm, K), lambda i: (i, 0)),
        ),
        compiler_params=pltpu.CompilerParams(
            dimension_semantics=("parallel",),
            vmem_limit_bytes=48 * 1024 * 1024),
    )(z, w1, w2, p1, p2)
    return out[:M]


def independent_spatial_ctx_forward(x, y, params, *, act_on_last_layer=True,
                                    tm=512):
    """forward(x, y) -> (do_forward(x), do_forward(y)).

    x, y: (..., kps_dim). Both branches are fused into one pallas_call
    (weights DMA'd once, single launch).
    """
    K = x.shape[-1]
    x2 = x.reshape(-1, K)
    y2 = y.reshape(-1, K)
    nx = x2.shape[0]
    z = jnp.concatenate([x2, y2], axis=0)
    out = _run_rows(z, params, act_on_last_layer=act_on_last_layer, tm=tm)
    return out[:nx].reshape(x.shape), out[nx:].reshape(y.shape)


def make_params(key, kps_dim):
    """Deterministic synthetic parameters (shapes from __init__)."""
    H = kps_dim * 10
    k1, k2 = jax.random.split(key)
    bound1 = 1.0 / jnp.sqrt(kps_dim)
    bound2 = 1.0 / jnp.sqrt(H)
    return {
        # Linear weights stored as (in, out)
        "w1": jax.random.uniform(k1, (kps_dim, H), jnp.float32, -bound1, bound1),
        "b1": jnp.zeros((H,), jnp.float32),
        "w2": jax.random.uniform(k2, (H, kps_dim), jnp.float32, -bound2, bound2),
        "b2": jnp.zeros((kps_dim,), jnp.float32),
        # LayerNorm affine params (PyTorch default init: ones / zeros)
        "g1": jnp.ones((H,), jnp.float32),
        "be1": jnp.zeros((H,), jnp.float32),
        "g2": jnp.ones((kps_dim,), jnp.float32),
        "be2": jnp.zeros((kps_dim,), jnp.float32),
    }


def _reference_do_forward(x, params, act_on_last_layer=True):
    """Pure-JAX f32 reference of do_forward (for tolerance checking)."""
    def ln(v, g, b, eps=1e-5):
        mu = jnp.mean(v, axis=-1, keepdims=True)
        var = jnp.mean((v - mu) ** 2, axis=-1, keepdims=True)
        return (v - mu) * jax.lax.rsqrt(var + eps) * g + b

    x0 = x
    h = x @ params["w1"] + params["b1"]
    h = jnp.maximum(h, 0.0)
    h = ln(h, params["g1"], params["be1"])
    o = h @ params["w2"] + params["b2"]
    if act_on_last_layer:
        o = jnp.maximum(o, 0.0)
        o = ln(o, params["g2"], params["be2"])
        o = o + x0
    return o


if __name__ == "__main__":
    kps_dim = 39          # module default
    batch, seq = 2, 8     # 16 rows per branch, 32 rows fused

    key = jax.random.PRNGKey(0)
    kp, kx, ky = jax.random.split(key, 3)
    params = make_params(kp, kps_dim)

    x = jax.random.normal(kx, (batch, seq, kps_dim), jnp.float32)
    y = jax.random.normal(ky, (batch, seq, kps_dim), jnp.float32)

    out_x, out_y = independent_spatial_ctx_forward(x, y, params,
                                                   act_on_last_layer=True)
    jax.block_until_ready(out_x)
    jax.block_until_ready(out_y)

    assert out_x.shape == x.shape and out_y.shape == y.shape

    # Tolerance check vs. f32 pure-JAX reference (kernel uses bf16 MXU operands).
    ref_x = _reference_do_forward(x, params)
    ref_y = _reference_do_forward(y, params)
    np.testing.assert_allclose(np.asarray(out_x), np.asarray(ref_x),
                               rtol=5e-2, atol=5e-2)
    np.testing.assert_allclose(np.asarray(out_y), np.asarray(ref_y),
                               rtol=5e-2, atol=5e-2)

    print("KERNEL_OK")
</pallas_src>

<mosaic_0001>
module attributes {stable_mosaic.version = 11 : i64} {
  func.func @ctx_kernel(%arg0: i32, %arg1: memref<32x39xf32, #tpu.memory_space<vmem>>, %arg2: memref<39x390xbf16, #tpu.memory_space<vmem>>, %arg3: memref<390x39xbf16, #tpu.memory_space<vmem>>, %arg4: memref<3x390xf32, #tpu.memory_space<vmem>>, %arg5: memref<3x39xf32, #tpu.memory_space<vmem>>, %arg6: memref<32x39xf32, #tpu.memory_space<vmem>>) attributes {dimension_semantics = [#tpu.dimension_semantics<parallel>], iteration_bounds = array<i64: 1>, scalar_prefetch = 0 : i64, scratch_operands = 0 : i64, tpu.core_type = #tpu.core_type<tc>, window_params = [{transform_indices = @transform_0, window_bounds = array<i64: 32, 39>}, {pipeline_mode = #tpu.pipeline_mode<synchronous>, transform_indices = @transform_1, window_bounds = array<i64: 39, 390>}, {pipeline_mode = #tpu.pipeline_mode<synchronous>, transform_indices = @transform_2, window_bounds = array<i64: 390, 39>}, {pipeline_mode = #tpu.pipeline_mode<synchronous>, transform_indices = @transform_3, window_bounds = array<i64: 3, 390>}, {pipeline_mode = #tpu.pipeline_mode<synchronous>, transform_indices = @transform_4, window_bounds = array<i64: 3, 39>}, {transform_indices = @transform_5, window_bounds = array<i64: 32, 39>}]} {
    %c0 = arith.constant 0 : index
    %c0_0 = arith.constant 0 : index
    %0 = vector.load %arg1[%c0, %c0_0] : memref<32x39xf32, #tpu.memory_space<vmem>>, vector<32x39xf32>
    %c0_1 = arith.constant 0 : index
    %c0_2 = arith.constant 0 : index
    %1 = vector.load %arg4[%c0_1, %c0_2] : memref<3x390xf32, #tpu.memory_space<vmem>>, vector<3x390xf32>
    %c0_3 = arith.constant 0 : index
    %c0_4 = arith.constant 0 : index
    %2 = vector.load %arg5[%c0_3, %c0_4] : memref<3x39xf32, #tpu.memory_space<vmem>>, vector<3x39xf32>
    %3 = arith.truncf %0 : vector<32x39xf32> to vector<32x39xbf16>
    %c0_5 = arith.constant 0 : index
    %c0_6 = arith.constant 0 : index
    %4 = vector.load %arg2[%c0_5, %c0_6] : memref<39x390xbf16, #tpu.memory_space<vmem>>, vector<39x390xbf16>
    %cst = arith.constant dense<0.000000e+00> : vector<32x390xf32>
    %5 = tpu.matmul %3, %4, %cst {dimension_numbers = #tpu.dot_dimension_numbers<[1], [0], [0], [1], [0, 0, 1, 1], [], []>} : vector<32x39xbf16>, vector<39x390xbf16>, vector<32x390xf32> -> vector<32x390xf32>
    %6 = vector.extract_strided_slice %1 {offsets = [0, 0], sizes = [1, 390], strides = [1, 1]} : vector<3x390xf32> to vector<1x390xf32>
    %7 = vector.broadcast %6 : vector<1x390xf32> to vector<32x390xf32>
    %8 = arith.addf %5, %7 : vector<32x390xf32>
    %cst_7 = arith.constant 0.000000e+00 : f32
    %9 = vector.broadcast %cst_7 : f32 to vector<32x390xf32>
    %10 = arith.maximumf %8, %9 : vector<32x390xf32>
    %11 = vector.extract_strided_slice %1 {offsets = [1, 0], sizes = [1, 390], strides = [1, 1]} : vector<3x390xf32> to vector<1x390xf32>
    %12 = vector.extract_strided_slice %1 {offsets = [2, 0], sizes = [1, 390], strides = [1, 1]} : vector<3x390xf32> to vector<1x390xf32>
    %cst_8 = arith.constant dense<0.000000e+00> : vector<32xf32>
    %13 = vector.multi_reduction <add>, %10, %cst_8 [1] : vector<32x390xf32> to vector<32xf32>
    %14 = vector.shape_cast %13 : vector<32xf32> to vector<32x1xf32>
    %cst_9 = arith.constant 3.900000e+02 : f32
    %15 = vector.broadcast %cst_9 : f32 to vector<32x1xf32>
    %16 = arith.divf %14, %15 : vector<32x1xf32>
    %17 = arith.mulf %10, %10 : vector<32x390xf32>
    %cst_10 = arith.constant dense<0.000000e+00> : vector<32xf32>
    %18 = vector.multi_reduction <add>, %17, %cst_10 [1] : vector<32x390xf32> to vector<32xf32>
    %19 = vector.shape_cast %18 : vector<32xf32> to vector<32x1xf32>
    %cst_11 = arith.constant 3.900000e+02 : f32
    %20 = vector.broadcast %cst_11 : f32 to vector<32x1xf32>
    %21 = arith.divf %19, %20 : vector<32x1xf32>
    %22 = arith.mulf %16, %16 : vector<32x1xf32>
    %23 = arith.subf %21, %22 : vector<32x1xf32>
    %24 = vector.broadcast %16 : vector<32x1xf32> to vector<32x390xf32>
    %25 = arith.subf %10, %24 : vector<32x390xf32>
    %cst_12 = arith.constant 9.99999974E-6 : f32
    %26 = vector.broadcast %cst_12 : f32 to vector<32x1xf32>
    %27 = arith.addf %23, %26 : vector<32x1xf32>
    %28 = math.rsqrt %27 : vector<32x1xf32>
    %29 = vector.broadcast %28 : vector<32x1xf32> to vector<32x390xf32>
    %30 = arith.mulf %25, %29 : vector<32x390xf32>
    %31 = vector.broadcast %11 : vector<1x390xf32> to vector<32x390xf32>
    %32 = arith.mulf %30, %31 : vector<32x390xf32>
    %33 = vector.broadcast %12 : vector<1x390xf32> to vector<32x390xf32>
    %34 = arith.addf %32, %33 : vector<32x390xf32>
    %35 = arith.truncf %34 : vector<32x390xf32> to vector<32x390xbf16>
    %c0_13 = arith.constant 0 : index
    %c0_14 = arith.constant 0 : index
    %36 = vector.load %arg3[%c0_13, %c0_14] : memref<390x39xbf16, #tpu.memory_space<vmem>>, vector<390x39xbf16>
    %cst_15 = arith.constant dense<0.000000e+00> : vector<32x39xf32>
    %37 = tpu.matmul %35, %36, %cst_15 {dimension_numbers = #tpu.dot_dimension_numbers<[1], [0], [0], [1], [0, 0, 1, 1], [], []>} : vector<32x390xbf16>, vector<390x39xbf16>, vector<32x39xf32> -> vector<32x39xf32>
    %38 = vector.extract_strided_slice %2 {offsets = [0, 0], sizes = [1, 39], strides = [1, 1]} : vector<3x39xf32> to vector<1x39xf32>
    %39 = vector.broadcast %38 : vector<1x39xf32> to vector<32x39xf32>
    %40 = arith.addf %37, %39 : vector<32x39xf32>
    %cst_16 = arith.constant 0.000000e+00 : f32
    %41 = vector.broadcast %cst_16 : f32 to vector<32x39xf32>
    %42 = arith.maximumf %40, %41 : vector<32x39xf32>
    %43 = vector.extract_strided_slice %2 {offsets = [1, 0], sizes = [1, 39], strides = [1, 1]} : vector<3x39xf32> to vector<1x39xf32>
    %44 = vector.extract_strided_slice %2 {offsets = [2, 0], sizes = [1, 39], strides = [1, 1]} : vector<3x39xf32> to vector<1x39xf32>
    %cst_17 = arith.constant dense<0.000000e+00> : vector<32xf32>
    %45 = vector.multi_reduction <add>, %42, %cst_17 [1] : vector<32x39xf32> to vector<32xf32>
    %46 = vector.shape_cast %45 : vector<32xf32> to vector<32x1xf32>
    %cst_18 = arith.constant 3.900000e+01 : f32
    %47 = vector.broadcast %cst_18 : f32 to vector<32x1xf32>
    %48 = arith.divf %46, %47 : vector<32x1xf32>
    %49 = arith.mulf %42, %42 : vector<32x39xf32>
    %cst_19 = arith.constant dense<0.000000e+00> : vector<32xf32>
    %50 = vector.multi_reduction <add>, %49, %cst_19 [1] : vector<32x39xf32> to vector<32xf32>
    %51 = vector.shape_cast %50 : vector<32xf32> to vector<32x1xf32>
    %cst_20 = arith.constant 3.900000e+01 : f32
    %52 = vector.broadcast %cst_20 : f32 to vector<32x1xf32>
    %53 = arith.divf %51, %52 : vector<32x1xf32>
    %54 = arith.mulf %48, %48 : vector<32x1xf32>
    %55 = arith.subf %53, %54 : vector<32x1xf32>
    %56 = vector.broadcast %48 : vector<32x1xf32> to vector<32x39xf32>
    %57 = arith.subf %42, %56 : vector<32x39xf32>
    %cst_21 = arith.constant 9.99999974E-6 : f32
    %58 = vector.broadcast %cst_21 : f32 to vector<32x1xf32>
    %59 = arith.addf %55, %58 : vector<32x1xf32>
    %60 = math.rsqrt %59 : vector<32x1xf32>
    %61 = vector.broadcast %60 : vector<32x1xf32> to vector<32x39xf32>
    %62 = arith.mulf %57, %61 : vector<32x39xf32>
    %63 = vector.broadcast %43 : vector<1x39xf32> to vector<32x39xf32>
    %64 = arith.mulf %62, %63 : vector<32x39xf32>
    %65 = vector.broadcast %44 : vector<1x39xf32> to vector<32x39xf32>
    %66 = arith.addf %64, %65 : vector<32x39xf32>
    %67 = arith.addf %66, %0 : vector<32x39xf32>
    %c0_22 = arith.constant 0 : index
    %c0_23 = arith.constant 0 : index
    %68 = vector.load %arg6[%c0_22, %c0_23] : memref<32x39xf32, #tpu.memory_space<vmem>>, vector<32x39xf32>
    tpu.vector_store %arg6[%c0_22, %c0_23], %67 {strides = array<i32>} : memref<32x39xf32, #tpu.memory_space<vmem>>, vector<32x39xf32>,
    return
  }
  func.func @transform_0(%arg0: i32) -> (i32, i32) {
    %c0_i32 = arith.constant 0 : i32
    %c0_i32_0 = arith.constant 0 : i32
    return %arg0, %c0_i32 : i32, i32
  }
  func.func @transform_1(%arg0: i32) -> (i32, i32) {
    %c0_i32 = arith.constant 0 : i32
    %c0_i32_0 = arith.constant 0 : i32
    %c0_i32_1 = arith.constant 0 : i32
    return %c0_i32, %c0_i32_0 : i32, i32
  }
  func.func @transform_2(%arg0: i32) -> (i32, i32) {
    %c0_i32 = arith.constant 0 : i32
    %c0_i32_0 = arith.constant 0 : i32
    %c0_i32_1 = arith.constant 0 : i32
    return %c0_i32, %c0_i32_0 : i32, i32
  }
  func.func @transform_3(%arg0: i32) -> (i32, i32) {
    %c0_i32 = arith.constant 0 : i32
    %c0_i32_0 = arith.constant 0 : i32
    %c0_i32_1 = arith.constant 0 : i32
    return %c0_i32, %c0_i32_0 : i32, i32
  }
  func.func @transform_4(%arg0: i32) -> (i32, i32) {
    %c0_i32 = arith.constant 0 : i32
    %c0_i32_0 = arith.constant 0 : i32
    %c0_i32_1 = arith.constant 0 : i32
    return %c0_i32, %c0_i32_0 : i32, i32
  }
  func.func @transform_5(%arg0: i32) -> (i32, i32) {
    %c0_i32 = arith.constant 0 : i32
    %c0_i32_0 = arith.constant 0 : i32
    return %arg0, %c0_i32 : i32, i32
  }
}

</mosaic_0001>

<bundles_post_ra>
// kernel: tpu_custom_call.1
= control target key start
LH: loop header
LB: loop body
LE: loop exit
PB: predicated region body
PF: predicated region fallthrough
CT: control target
= control target key end

     0   :  { %vm136_vm0 = vcmask 1042432   ;;  %vm137_vm1 = vcmask 1043456   ;;  %v1075_v3 = vmov 65535   ;;  %v1076_v15 = vmov 0   ;;  %s1532_s0 = inlined_call_operand.vmem [shape: f32[32,39], index: 0, kind: input, shape index: {}]   ;;  %s1533_s1 = inlined_call_operand.vmem [shape: bf16[39,390], index: 1, kind: input, shape index: {}]   ;;  %s1534_s2 = inlined_call_operand.vmem [shape: bf16[390,39], index: 2, kind: input, shape index: {}]   ;;  %s1535_s3 = inlined_call_operand.vmem [shape: f32[3,390], index: 3, kind: input, shape index: {}]   ;;  %s1536_s4 = inlined_call_operand.vmem [shape: f32[3,39], index: 4, kind: input, shape index: {}]   ;;  %s1537_s5 = inlined_call_operand.hbm [shape: f32[32,39], index: 5, kind: output, shape index: {}]  }
   0x1   :  { %v39_v0 = vld [vmem:[%s1533_s1 + $0x40] sm:$0xff]  ;;  %v40_v1 = vld [vmem:[%s1533_s1 + $0x48] sm:$0xff]  ;;  %v138_v4 = vsel %vm136_vm0, 4294967295, %v1075_v3  ;;  %184 = vmatprep.mubr.bf16.mxu0 %v1076_v15  ;;  %237 = vmatprep.mubr.bf16.mxu1 %v1076_v15  ;;  %vm129_vm2 = vcmask 318464   ;;  %v1159_v25 = vld [vmem:[%s1532_s0 + $0x10] sm:$0xff] }
   0x2   :  { %v929_v2 = vcombine.high %v39_v0, %v39_v0  ;;  %v931_v5 = vcombine.high %v40_v1, %v40_v1  ;;  %v928_v6 = vcombine.low %v39_v0, %v39_v0  ;;  %v139_v7 = vsel %vm137_vm1, %v138_v4, 0  ;;  %v1000_v9 = vld [vmem:[%s1533_s1 + $0x24] ss:$16 sps:$4 sm:$0xff]   ;;  %v1002_v13 = vld [vmem:[%s1533_s1 + $0x2c] ss:$16 sps:$4 sm:$0xff]  }
   0x3   :  { %v930_v8 = vcombine.low %v40_v1, %v40_v1  ;;  %v1004_v16 = vld [vmem:[%s1533_s1 + $0x20] ss:$16 sps:$4 sm:$0xff]   ;;  %v1005_v17 = vld [vmem:[%s1533_s1 + $0x28] ss:$16 sps:$4 sm:$0xff]   ;;  %v1006_v18 = vld [vmem:[%s1533_s1 + $0x4] ss:$16 sps:$4 sm:$0xff]  }
   0x4   :  { %v144_v10 = vand.u32 %v929_v2, %v139_v7  ;;  %v150_v11 = vand.u32 %v931_v5, %v139_v7  ;;  %v141_v12 = vand.u32 %v928_v6, %v139_v7  ;;  %v1008_v19 = vld [vmem:[%s1533_s1 + $0xc] ss:$16 sps:$4 sm:$0xff]   ;;  %v1010_v20 = vld [vmem:[%s1533_s1] ss:$16 sps:$4 sm:$0xff]   ;;  %v1011_v21 = vld [vmem:[%s1533_s1 + $0x8] ss:$16 sps:$4 sm:$0xff]  }
   0x5   :  { %v147_v14 = vand.u32 %v930_v8, %v139_v7  ;;  %v1146_v22 = vld [vmem:[%s1532_s0] sm:$0xff]  ;;  %v1151_v23 = vld [vmem:[%s1532_s0 + $0x8] sm:$0xff]  ;;  %v1164_v26 = vld [vmem:[%s1532_s0 + $0x18] sm:$0xff] }
   0x6   :  { %162 = vmatprep.subr.bf16.mxu0 %v144_v10  ;;  %215 = vmatprep.subr.bf16.mxu1 %v150_v11  ;;  %v29_v24 = vpack.c.bf16 %v1151_v23, %v1146_v22  ;;  %v30_v27 = vpack.c.bf16 %v1164_v26, %v1159_v25 }
   0x7   :  { %163 = vmatpush1.bf16.msra.mxu0 %v141_v12  ;;  %216 = vmatpush1.bf16.msra.mxu1 %v147_v14 }
   0x8   :  { %164 = vmatprep.subr.bf16.mxu0 %v1000_v9  ;;  %217 = vmatprep.subr.bf16.mxu1 %v1002_v13 }
   0xb   :  { %165 = vmatpush1.bf16.msra.mxu0 %v1004_v16  ;;  %218 = vmatpush1.bf16.msra.mxu1 %v1005_v17 }
   0xc   :  { %166 = vmatprep.subr.bf16.mxu0 %v1006_v18  ;;  %219 = vmatprep.subr.bf16.mxu1 %v1008_v19 }
   0xf   :  { %167 = vmatpush1.bf16.msra.mxu0 %v1010_v20  ;;  %220 = vmatpush1.bf16.msra.mxu1 %v1011_v21 }
  0x10   :  { %766 = vmatprep.subr.bf16.mxu1 %v1076_v15 }
  0x12   :  { %932 = vmatmul.mubr.msk.bf16.vlgmr.msra.gmra.mxu0 %vm129_vm2, %v29_v24  ;;  %934 = vmatmul.mubr.msk.bf16.vlgmr.msra.gmra.mxu1 %vm129_vm2, %v29_v24 }
  0x13   :  { %194 = vmatprep.mubr.bf16.mxu0 %v1076_v15  ;;  %247 = vmatprep.mubr.bf16.mxu1 %v1076_v15 }
  0x14   :  { %10 = vsyncpa [#allocation3], 0  ;;  %v43_v28 = vlaneseq  ;;  %v1182_v31 = vld [vmem:[%s1535_s3] sm:$0x77]  ;;  %v1187_v32 = vld [vmem:[%s1535_s3 + $0x8] sm:$0x77] }
  0x15   :  { %vm276_vm3 = vcmask 48128  }
  0x16   :  { %v1174_v29 = vshrl.u32 %v43_v28, 7 }
  0x18   :  { %v1177_v30 = vsub.s32 0, %v1174_v29  ;;  %v49_v33 = vsub.s32 4, %v1174_v29 }
  0x1a   :  { %933 = vmatmul.mubr.msk.bf16.gmra.mxu0 %vm129_vm2, %v30_v27  ;;  %935 = vmatmul.mubr.msk.bf16.gmra.mxu1 %vm129_vm2, %v30_v27  ;;  %v46_v34 = vrot.slane %v1182_v31, %v1177_v30  ;;  %v54_v35 = vrot.slane %v1187_v32, %v1177_v30  ;;  %v50_v36 = vrot.slane %v1182_v31, %v49_v33 }
  0x1b   :  { %v58_v37 = vrot.slane %v1187_v32, %v49_v33 }
  0x1c   :  { %v66_v38 = vrot.slane %v46_v34, %v1177_v30  ;;  %v74_v39 = vrot.slane %v54_v35, %v1177_v30  ;;  %v70_v40 = vrot.slane %v50_v36, %v1177_v30 }
  0x1d   :  { %v78_v41 = vrot.slane %v58_v37, %v1177_v30 }
  0xd2   :  { %v186_v42 = vpop.f32.mrf.mxu0  ;;  %v239_v43 = vpop.f32.mrf.mxu1 }
  0xd3   :  { %v187_v44 = vadd.f32 %v186_v42, %v66_v38  ;;  %v240_v45 = vadd.f32 %v239_v43, %v74_v39 }
  0xd4   :  { %v188_v46 = vpop.f32.mrf.mxu0  ;;  %v241_v47 = vpop.f32.mrf.mxu1 }
  0xd5   :  { %v189_v48 = vadd.f32 %v188_v46, %v70_v40  ;;  %v242_v49 = vadd.f32 %v241_v47, %v78_v41  ;;  %v1200_v50 = vmax.f32 %v187_v44, 0.0  ;;  %v1202_v51 = vmax.f32 %v240_v45, 0.0 }
  0xd6   :  { %v190_v52 = vpop.f32.mrf.mxu0  ;;  %v243_v53 = vpop.f32.mrf.mxu1 }
  0xd7   :  { %v1204_v54 = vmax.f32 %v189_v48, 0.0  ;;  %v1206_v55 = vmax.f32 %v242_v49, 0.0  ;;  %v191_v56 = vadd.f32 %v190_v52, %v66_v38  ;;  %v244_v57 = vadd.f32 %v243_v53, %v74_v39 }
  0xd8   :  { %v192_v58 = vpop.f32.mrf.mxu0  ;;  %v245_v59 = vpop.f32.mrf.mxu1  ;;  %v304_v0 = vmul.f32 %v1200_v50, %v1200_v50  ;;  %v306_v4 = vmul.f32 %v1202_v51, %v1202_v51 }
  0xd9   :  { %v305_v60 = vmul.f32 %v1204_v54, %v1204_v54  ;;  %v1210_v61 = vmax.f32 %v191_v56, 0.0  ;;  %v193_v62 = vadd.f32 %v192_v58, %v70_v40  ;;  %v246_v63 = vadd.f32 %v245_v59, %v78_v41 }
  0xda   :  { %v196_v1 = vpop.f32.mrf.mxu0  ;;  %v249_v2 = vpop.f32.mrf.mxu1  ;;  %v274_v3 = vadd.f32 %v1204_v54, %v1200_v50  ;;  %v307_v5 = vmul.f32 %v1206_v55, %v1206_v55  ;;  %v1220_v6 = vmax.f32 %v244_v57, 0.0  ;;  %v277_v13 = vsel %vm276_vm3, %v1206_v55, 0.0 }
  0xdb   :  { %v1222_v7 = vmax.f32 %v193_v62, 0.0  ;;  %v197_v8 = vadd.f32 %v196_v1, %v66_v38  ;;  %v250_v9 = vadd.f32 %v249_v2, %v74_v39  ;;  %v320_v14 = vadd.f32 %v305_v60, %v304_v0 }
  0xdc   :  { %v198_v10 = vpop.f32.mrf.mxu0  ;;  %v251_v11 = vpop.f32.mrf.mxu1  ;;  %v275_v12 = vadd.f32 %v274_v3, %v1202_v51  ;;  %v308_v16 = vmul.f32 %v1210_v61, %v1210_v61  ;;  %v1229_v17 = vmax.f32 %v246_v63, 0.0  ;;  %v322_v19 = vsel %vm276_vm3, %v307_v5, 0.0 }
  0xdd   :  { %v199_v18 = vadd.f32 %v198_v10, %v70_v40  ;;  %v252_v20 = vadd.f32 %v251_v11, %v78_v41  ;;  %v321_v28 = vadd.f32 %v320_v14, %v306_v4  ;;  %v281_v33 = vadd.f32 %v1222_v7, %v1210_v61 }
  0xde   :  { %v200_v21 = vpop.f32.mrf.mxu0  ;;  %v253_v24 = vpop.f32.mrf.mxu1  ;;  %v278_v27 = vadd.f32 %v277_v13, %v275_v12  ;;  %v309_v34 = vmul.f32 %v1222_v7, %v1222_v7  ;;  %v1236_v35 = vmax.f32 %v197_v8, 0.0  ;;  %v1240_v42 = vmax.f32 %v250_v9, 0.0 }
  0xdf   :  { %v1238_v36 = vmax.f32 %v199_v18, 0.0  ;;  %v201_v37 = vadd.f32 %v200_v21, %v66_v38  ;;  %v254_v43 = vadd.f32 %v253_v24, %v74_v39  ;;  %v323_v46 = vadd.f32 %v322_v19, %v321_v28 }
  0xe0   :  { %279 = vadd.xlane.f32.xlu0 %v278_v27  ;;  %v202_v44 = vpop.f32.mrf.mxu0  ;;  %v255_v45 = vpop.f32.mrf.mxu1  ;;  %v282_v47 = vadd.f32 %v281_v33, %v1220_v6  ;;  %v283_v53 = vsel %vm276_vm3, %v1229_v17, 0.0  ;;  %v1249_v38 = vmax.f32 %v252_v20, 0.0  ;;  %v311_v57 = vmul.f32 %v1229_v17, %v1229_v17 }
  0xe1   :  { %v1243_v48 = vmax.f32 %v201_v37, 0.0  ;;  %v203_v49 = vadd.f32 %v202_v44, %v70_v40  ;;  %v256_v52 = vadd.f32 %v255_v45, %v78_v41  ;;  %v313_v56 = vmul.f32 %v1238_v36, %v1238_v36  ;;  %324 = vadd.xlane.f32.xlu1 %v323_v46  ;;  %v1013_v44 = vld [vmem:[%s1534_s2 + $0x78] sm:$0xff]   ;;  %v1015_v46 = vld [vmem:[%s1534_s2 + $0xb0] sm:$0xff]  }
  0xe2   :  { %v284_v39 = vadd.f32 %v283_v53, %v282_v47  ;;  %v312_v58 = vmul.f32 %v1236_v35, %v1236_v35  ;;  %v310_v40 = vmul.f32 %v1220_v6, %v1220_v6  ;;  %v326_v41 = vadd.f32 %v309_v34, %v308_v16  ;;  %v1012_v34 = vld [vmem:[%s1534_s2 + $0xb8] sm:$0xff]   ;;  %963 = vmatprep.subr.bf16.mxu0 %v1013_v44  ;;  %v1016_v47 = vld [vmem:[%s1534_s2 + $0x70] sm:$0xff]   ;;  %v1019_v53 = vld [vmem:[%s1534_s2 + $0x68] sm:$0xff]  }
  0xe3   :  { %v1255_v59 = vmax.f32 %v203_v49, 0.0  ;;  %v1259_v60 = vmax.f32 %v254_v43, 0.0  ;;  %v1261_v62 = vmax.f32 %v256_v52, 0.0  ;;  %v287_v63 = vadd.f32 %v1238_v36, %v1236_v35  ;;  %767 = vmatpush1.bf16.msra.mxu1 %v1012_v34  ;;  %v1014_v45 = vld [vmem:[%s1534_s2 + $0x38] sm:$0xff]   ;;  %v1017_v49 = vld [vmem:[%s1534_s2 + $0x30] sm:$0xff]   ;;  %v1018_v52 = vld [vmem:[%s1534_s2 + $0xa8] sm:$0xff]  }
  0xe4   :  { %285 = vadd.xlane.f32.xlu0 %v284_v39  ;;  %v314_v0 = vmul.f32 %v1240_v42, %v1240_v42  ;;  %v316_v1 = vmul.f32 %v1243_v48, %v1243_v48  ;;  %v327_v3 = vadd.f32 %v326_v41, %v310_v40  ;;  %v328_v5 = vsel %vm276_vm3, %v311_v57, 0.0  ;;  %768 = vmatprep.subr.bf16.mxu1 %v1076_v15  ;;  %v1021_v39 = vld [vmem:[%s1534_s2 + $0xa0] sm:$0xff]   ;;  %v1024_v40 = vld [vmem:[%s1534_s2 + $0x98] sm:$0xff]  }
  0xe5   :  { %v317_v2 = vmul.f32 %v1255_v59, %v1255_v59  ;;  %v293_v4 = vadd.f32 %v1255_v59, %v1243_v48  ;;  %v288_v8 = vadd.f32 %v287_v63, %v1240_v42  ;;  %v289_v9 = vsel %vm276_vm3, %v1249_v38, 0.0  ;;  %964 = vmatpush3.bf16.msra.mxu0 %v1014_v45  ;;  %v1022_v57 = vld [vmem:[%s1534_s2 + $0x60] sm:$0xff]   ;;  %v1025_v41 = vld [vmem:[%s1534_s2 + $0x58] sm:$0xff]  }
  0xe6   :  { %v332_v10 = vadd.f32 %v313_v56, %v312_v58  ;;  %v329_v11 = vadd.f32 %v328_v5, %v327_v3  ;;  %v315_v13 = vmul.f32 %v1249_v38, %v1249_v38  ;;  %v295_v18 = vsel %vm276_vm3, %v1261_v62, 0.0  ;;  %965 = vmatprep.subr.bf16.mxu0 %v1016_v47  ;;  %v1020_v56 = vld [vmem:[%s1534_s2 + $0x28] sm:$0xff]   ;;  %v1023_v58 = vld [vmem:[%s1534_s2 + $0x20] sm:$0xff]   ;;  %v1026_v63 = vld [vmem:[%s1534_s2 + $0x18] sm:$0xff]  }
  0xe7   :  { %v294_v12 = vadd.f32 %v293_v4, %v1259_v60  ;;  %v338_v14 = vadd.f32 %v317_v2, %v316_v1  ;;  %v290_v16 = vadd.f32 %v289_v9, %v288_v8  ;;  %v318_v21 = vmul.f32 %v1259_v60, %v1259_v60  ;;  %769 = vmatpush1.bf16.msra.mxu1 %v1015_v46  ;;  %v1028_v1 = vld [vmem:[%s1534_s2 + $0x50] sm:$0xff]   ;;  %v1030_v3 = vld [vmem:[%s1534_s2 + $0x88] sm:$0xff]   ;;  %v1033_v8 = vld [vmem:[%s1534_s2 + $0x80] sm:$0xff]  }
  0xe8   :  { %v333_v19 = vadd.f32 %v332_v10, %v314_v0  ;;  %330 = vadd.xlane.f32.xlu1 %v329_v11  ;;  %v319_v24 = vmul.f32 %v1261_v62, %v1261_v62  ;;  %v334_v27 = vsel %vm276_vm3, %v315_v13, 0.0  ;;  %770 = vmatprep.subr.bf16.mxu1 %v1076_v15  ;;  %v1027_v0 = vld [vmem:[%s1534_s2 + $0x90] sm:$0xff]   ;;  %v1031_v4 = vld [vmem:[%s1534_s2 + $0x48] sm:$0xff]   ;;  %v1034_v9 = vld [vmem:[%s1534_s2 + $0x40] sm:$0xff]   ;;  %v402_v45 = vsub.s32 5, %v1174_v29 }
  0xe9   :  { %v296_v20 = vadd.f32 %v295_v18, %v294_v12  ;;  %291 = vadd.xlane.f32.xlu0 %v290_v16  ;;  %v339_v28 = vadd.f32 %v338_v14, %v318_v21  ;;  %966 = vmatpush3.bf16.msra.mxu0 %v1017_v49  ;;  %v1029_v2 = vld [vmem:[%s1534_s2 + $0x10] sm:$0xff]   ;;  %v1032_v5 = vld [vmem:[%s1534_s2 + $0x8] sm:$0xff]   ;;  %v1036_v10 = vld [vmem:[%s1534_s2 + $0xc0] ss:$0 sps:$4 sm:$0x77]  }
  0xea   :  { %v335_v33 = vadd.f32 %v334_v27, %v333_v19  ;;  %v340_v37 = vsel %vm276_vm3, %v319_v24, 0.0  ;;  %967 = vmatprep.subr.bf16.mxu0 %v1019_v53  ;;  %v1035_v11 = vld [vmem:[%s1534_s2] sm:$0xff]   ;;  %v715_v12 = vsel %vm136_vm0, %v1036_v10, 0 }
  0xeb   :  { %v341_v43 = vadd.f32 %v340_v37, %v339_v28  ;;  %771 = vmatpush1.bf16.msra.mxu1 %v1018_v52 }
  0xec   :  { %297 = vadd.xlane.f32.xlu1 %v296_v20  ;;  %772 = vmatprep.subr.bf16.mxu1 %v1076_v15 }
  0xed   :  { %336 = vadd.xlane.f32.xlu0 %v335_v33  ;;  %968 = vmatpush3.bf16.msra.mxu0 %v1020_v56  ;;  %v1384_v56 = vsub.s32 1, %v1174_v29 }
  0xee   :  { %969 = vmatprep.subr.bf16.mxu0 %v1022_v57 }
  0xef   :  { %773 = vmatpush1.bf16.msra.mxu1 %v1021_v39 }
  0xf0   :  { %342 = vadd.xlane.f32.xlu1 %v341_v43  ;;  %774 = vmatprep.subr.bf16.mxu1 %v1076_v15 }
  0xf1   :  { %970 = vmatpush3.bf16.msra.mxu0 %v1023_v58  ;;  %v403_v58 = vrot.slane %v1182_v31, %v402_v45 }
  0xf2   :  { %971 = vmatprep.subr.bf16.mxu0 %v1025_v41 }
  0xf3   :  { %775 = vmatpush1.bf16.msra.mxu1 %v1024_v40  ;;  %v454_v40 = vsub.s32 6, %v1174_v29 }
  0xf4   :  { %776 = vmatprep.subr.bf16.mxu1 %v1076_v15 }
  0xf5   :  { %972 = vmatpush3.bf16.msra.mxu0 %v1026_v63 }
  0xf6   :  { %973 = vmatprep.subr.bf16.mxu0 %v1028_v1 }
  0xf7   :  { %777 = vmatpush1.bf16.msra.mxu1 %v1027_v0  ;;  %v1391_v0 = vsub.s32 2, %v1174_v29  ;;  %v463_v29 = vrot.slane %v1187_v32, %v454_v40 }
  0xf8   :  { %778 = vmatprep.subr.bf16.mxu1 %v1076_v15 }
  0xf9   :  { %974 = vmatpush3.bf16.msra.mxu0 %v1029_v2 }
  0xfa   :  { %975 = vmatprep.subr.bf16.mxu0 %v1031_v4  ;;  %v399_v4 = vrot.slane %v1182_v31, %v1384_v56 }
  0xfb   :  { %779 = vmatpush1.bf16.msra.mxu1 %v1030_v3  ;;  %v411_v3 = vrot.slane %v1187_v32, %v402_v45 }
  0xfc   :  { %780 = vmatprep.subr.bf16.mxu1 %v1076_v15 }
  0xfd   :  { %976 = vmatpush3.bf16.msra.mxu0 %v1032_v5  ;;  %v407_v5 = vrot.slane %v1187_v32, %v1384_v56 }
  0xfe   :  { %977 = vmatprep.subr.bf16.mxu0 %v1034_v9  ;;  %v455_v9 = vrot.slane %v1182_v31, %v454_v40 }
  0xff   :  { %781 = vmatpush1.bf16.msra.mxu1 %v1033_v8  ;;  %v1399_v8 = vrot.slane %v403_v58, %v1384_v56 }
 0x100   :  { %796 = vmatprep.subr.bf16.mxu1 %v1076_v15 }
 0x101   :  { %978 = vmatpush3.bf16.msra.mxu0 %v1035_v11  ;;  %v451_v11 = vrot.slane %v1182_v31, %v1391_v0  ;;  %v1418_v31 = vrot.slane %v407_v5, %v1384_v56 }
 0x103   :  { %797 = vmatpush2.bf16.msra.mxu1 %v715_v12  ;;  %v459_v12 = vrot.slane %v1187_v32, %v1391_v0 }
 0x169   :  { %v280_v13 = vpop.xlane.xlu0 %279 }
 0x16a   :  { %v300_v14 = vmul.f32 0.0025641026, %v280_v13  ;;  %v325_v16 = vpop.xlane.xlu1 %324 }
 0x16b   :  { %v344_v18 = vmul.f32 0.0025641026, %v325_v16 }
 0x16c   :  { %v348_v19 = vmul.f32 %v300_v14, %v300_v14  ;;  %v356_v16 = vsub.f32 %v1200_v50, %v300_v14 }
 0x16d   :  { %v286_v20 = vpop.xlane.xlu0 %285 }
 0x16e   :  { %v1372_v21 = vmul.f32 0.0025641026, %v286_v20  ;;  %v352_v24 = vsub.f32 %v344_v18, %v348_v19  ;;  %v358_v18 = vsub.f32 %v1202_v51, %v300_v14  ;;  %v359_v19 = vsub.f32 %v1206_v55, %v300_v14 }
 0x16f   :  { %v357_v20 = vsub.f32 %v1204_v54, %v300_v14  ;;  %v1421_v51 = vrot.slane %v455_v9, %v1391_v0  ;;  %v1424_v55 = vrot.slane %v463_v29, %v1391_v0  ;;  %v1427_v54 = vrot.slane %v451_v11, %v1391_v0 }
 0x170   :  { %v372_v27 = vadd.f32 1e-05, %v352_v24  ;;  %v349_v28 = vmul.f32 %v1372_v21, %v1372_v21  ;;  %v1412_v24 = vrot.slane %v411_v3, %v1384_v56  ;;  %v360_v14 = vsub.f32 %v1210_v61, %v1372_v21 }
 0x171   :  { %v331_v33 = vpop.xlane.xlu1 %330  ;;  %v361_v45 = vsub.f32 %v1222_v7, %v1372_v21 }
 0x172   :  { %1037 = vrsqrt.f32 %v372_v27  ;;  %v345_v15 = vmul.f32 0.0025641026, %v331_v33  ;;  %v292_v34 = vpop.xlane.xlu0 %291  ;;  %v1415_v27 = vrot.slane %v399_v4, %v1384_v56 }
 0x173   :  { %v1376_v37 = vmul.f32 0.0025641026, %v292_v34  ;;  %v363_v34 = vsub.f32 %v1229_v17, %v1372_v21 }
 0x174   :  { %v353_v43 = vsub.f32 %v345_v15, %v349_v28  ;;  %v362_v15 = vsub.f32 %v1220_v6, %v1372_v21 }
 0x175   :  { %v298_v44 = vpop.xlane.xlu1 %297  ;;  %v350_v52 = vmul.f32 %v1376_v37, %v1376_v37  ;;  %v364_v61 = vsub.f32 %v1236_v35, %v1376_v37  ;;  %v366_v21 = vsub.f32 %v1240_v42, %v1376_v37 }
 0x176   :  { %v373_v46 = vadd.f32 1e-05, %v353_v43  ;;  %v1379_v47 = vmul.f32 0.0025641026, %v298_v44  ;;  %v337_v49 = vpop.xlane.xlu0 %336  ;;  %v1436_v43 = vrot.slane %v459_v12, %v1391_v0  ;;  %v367_v44 = vsub.f32 %v1249_v38, %v1376_v37 }
 0x177   :  { %v346_v53 = vmul.f32 0.0025641026, %v337_v49 }
 0x178   :  { %1039 = vrsqrt.f32 %v373_v46  ;;  %v351_v41 = vmul.f32 %v1379_v47, %v1379_v47  ;;  %v365_v46 = vsub.f32 %v1238_v36, %v1376_v37  ;;  %v371_v7 = vsub.f32 %v1261_v62, %v1379_v47 }
 0x179   :  { %v354_v39 = vsub.f32 %v346_v53, %v350_v52  ;;  %v343_v57 = vpop.xlane.xlu1 %342  ;;  %v369_v36 = vsub.f32 %v1255_v59, %v1379_v47  ;;  %v368_v35 = vsub.f32 %v1243_v48, %v1379_v47 }
 0x17a   :  { %v347_v63 = vmul.f32 0.0025641026, %v343_v57 }
 0x17b   :  { %v374_v1 = vadd.f32 1e-05, %v354_v39 }
 0x17c   :  { %v355_v2 = vsub.f32 %v347_v63, %v351_v41 }
 0x17d   :  { %1041 = vrsqrt.f32 %v374_v1 }
 0x17e   :  { %v375_v10 = vadd.f32 1e-05, %v355_v2 }
 0x17f   :  { %v1038_v13 = vpop.eup %1037 }
 0x180   :  { %1043 = vrsqrt.f32 %v375_v10  ;;  %v381_v32 = vmul.f32 %v1038_v13, %v357_v20  ;;  %v383_v28 = vmul.f32 %v1038_v13, %v359_v19  ;;  %v380_v33 = vmul.f32 %v1038_v13, %v356_v16 }
 0x181   :  { %v382_v50 = vmul.f32 %v1038_v13, %v358_v18 }
 0x182   :  { %v433_v6 = vmul.f32 %v1399_v8, %v381_v32  ;;  %v435_v17 = vmul.f32 %v1412_v24, %v383_v28  ;;  %v432_v52 = vmul.f32 %v1415_v27, %v380_v33  ;;  %v370_v33 = vsub.f32 %v1259_v60, %v1379_v47 }
 0x183   :  { %v434_v53 = vmul.f32 %v1418_v31, %v382_v50 }
 0x184   :  { %v485_v2 = vadd.f32 %v1421_v51, %v433_v6  ;;  %v487_v62 = vadd.f32 %v1424_v55, %v435_v17  ;;  %v484_v59 = vadd.f32 %v1427_v54, %v432_v52 }
 0x185   :  { %v1040_v49 = vpop.eup %1039  ;;  %v486_v3 = vadd.f32 %v1436_v43, %v434_v53 }
 0x186   :  { %v385_v39 = vmul.f32 %v1040_v49, %v361_v45  ;;  %v387_v38 = vmul.f32 %v1040_v49, %v363_v34  ;;  %v384_v57 = vmul.f32 %v1040_v49, %v360_v14  ;;  %v386_v58 = vmul.f32 %v1040_v49, %v362_v15 }
 0x188   :  { %v437_v40 = vmul.f32 %v1399_v8, %v385_v39  ;;  %v439_v41 = vmul.f32 %v1412_v24, %v387_v38  ;;  %v436_v63 = vmul.f32 %v1415_v27, %v384_v57  ;;  %v438_v1 = vmul.f32 %v1418_v31, %v386_v58 }
 0x18a   :  { %v1042_v48 = vpop.eup %1041  ;;  %v489_v4 = vadd.f32 %v1421_v51, %v437_v40  ;;  %v491_v42 = vadd.f32 %v1424_v55, %v439_v41  ;;  %v488_v37 = vadd.f32 %v1427_v54, %v436_v63  ;;  %v490_v5 = vadd.f32 %v1436_v43, %v438_v1 }
 0x18b   :  { %v389_v9 = vmul.f32 %v1042_v48, %v365_v46  ;;  %v391_v10 = vmul.f32 %v1042_v48, %v367_v44  ;;  %v388_v29 = vmul.f32 %v1042_v48, %v364_v61  ;;  %v390_v11 = vmul.f32 %v1042_v48, %v366_v21 }
 0x18c   :  { %v501_v12 = vpack.c.bf16 %v489_v4, %v485_v2  ;;  %v503_v13 = vpack.c.bf16 %v491_v42, %v487_v62  ;;  %v500_v16 = vpack.c.bf16 %v488_v37, %v484_v59  ;;  %v502_v18 = vpack.c.bf16 %v490_v5, %v486_v3 }
 0x18d   :  { %v1044_v19 = vpop.eup %1043  ;;  %v441_v20 = vmul.f32 %v1399_v8, %v389_v9  ;;  %v443_v32 = vmul.f32 %v1412_v24, %v391_v10  ;;  %v440_v28 = vmul.f32 %v1415_v27, %v388_v29  ;;  %v442_v34 = vmul.f32 %v1418_v31, %v390_v11 }
 0x18e   :  { %749 = vmatprep.mubr.bf16.mxu0 %v501_v12  ;;  %961 = vmatprep.mubr.msk.bf16.mxu1 %vm276_vm3, %v503_v13  ;;  %v393_v50 = vmul.f32 %v1044_v19, %v369_v36  ;;  %v395_v14 = vmul.f32 %v1044_v19, %v371_v7  ;;  %v392_v15 = vmul.f32 %v1044_v19, %v368_v35 }
 0x18f   :  { %750 = vmatmul.mubr.bf16.vlgmr.msra.gmra.mxu0 %v500_v16  ;;  %799 = vmatmul.mubr.bf16.vlgmr.msra.gmra.mxu1 %v502_v18  ;;  %v394_v61 = vmul.f32 %v1044_v19, %v370_v33  ;;  %v493_v49 = vadd.f32 %v1421_v51, %v441_v20  ;;  %v495_v60 = vadd.f32 %v1424_v55, %v443_v32 }
 0x190   :  { %v445_v44 = vmul.f32 %v1399_v8, %v393_v50  ;;  %v447_v45 = vmul.f32 %v1412_v24, %v395_v14  ;;  %v444_v46 = vmul.f32 %v1415_v27, %v392_v15  ;;  %v492_v47 = vadd.f32 %v1427_v54, %v440_v28 }
 0x191   :  { %v446_v53 = vmul.f32 %v1418_v31, %v394_v61  ;;  %v494_v8 = vadd.f32 %v1436_v43, %v442_v34 }
 0x192   :  { %v497_v6 = vadd.f32 %v1421_v51, %v445_v44  ;;  %v499_v17 = vadd.f32 %v1424_v55, %v447_v45  ;;  %v496_v52 = vadd.f32 %v1427_v54, %v444_v46  ;;  %v1493_v51 = vld [vmem:[%s1536_s4] sm:$0x7]  ;;  %s1077_s4 = smov [#allocation2]  }
 0x193   :  { %v498_v38 = vadd.f32 %v1436_v43, %v446_v53  ;;  %v560_v54 = vrot.slane %v1493_v51, %v1177_v30  ;;  %s909_s19 = sshll.u32 %s1077_s4, 4  ;;  %s910_s19 = int_to_ptr.vmem [resolvable:$true] %s909_s19 }
 0x194   :  { %v505_v24 = vpack.c.bf16 %v497_v6, %v493_v49  ;;  %v507_v39 = vpack.c.bf16 %v499_v17, %v495_v60  ;;  %v504_v27 = vpack.c.bf16 %v496_v52, %v492_v47  ;;  %s1053_s0 = scalar_lea.vmem %s910_s19, 512  ;;  %p1058_p1 = scmp.lt.s32.totalorder %s910_s19, %s910_s19 }
 0x195   :  { %v506_v57 = vpack.c.bf16 %v498_v38, %v494_v8  ;;  %p1054_p0 = scmp.ne.s32.totalorder %s910_s19, %s1053_s0  ;;  %p1059_p2 = scmp.lt.s32.totalorder %s1053_s0, %s1053_s0 }
 0x196   :  { %757 = vmatprep.mubr.bf16.mxu0 %v505_v24  ;;  %962 = vmatprep.mubr.msk.bf16.mxu1 %vm276_vm3, %v507_v39 }
 0x197   :  { %758 = vmatmul.mubr.bf16.gmra.mxu0 %v504_v27  ;;  %807 = vmatmul.mubr.bf16.gmra.mxu1 %v506_v57  ;;  %p1060_p3 = por %p1059_p2, %p1058_p1 }
 0x199   :  { %p1061_p4 = pnand %p1060_p3, %p1054_p0 }
 0x24f   :  { %v979_v55 = vpop.f32.mrf.mxu0  ;;  %v800_v31 = vpop.f32.mrf.mxu1 }
 0x251   :  { %v980_v58 = vpop.f32.mrf.mxu0  ;;  %v802_v7 = vpop.f32.mrf.mxu1 }
 0x252   :  { %v981_v36 = vadd.f32 %v980_v58, %v979_v55 }
 0x253   :  { %v982_v43 = vpop.f32.mrf.mxu0  ;;  %v803_v35 = vpop.f32.mrf.mxu1 }
 0x254   :  { %v752_v21 = vadd.f32 %v981_v36, %v560_v54 }
 0x255   :  { %v983_v40 = vpop.f32.mrf.mxu0  ;;  %v805_v41 = vpop.f32.mrf.mxu1 }
 0x256   :  { %v801_v63 = vadd.f32 %v800_v31, %v752_v21  ;;  %v984_v1 = vadd.f32 %v983_v40, %v982_v43 }
 0x257   :  { %v985_v2 = vpop.f32.mrf.mxu0  ;;  %v808_v59 = vpop.f32.mrf.mxu1 }
 0x258   :  { %v755_v62 = vadd.f32 %v984_v1, %v560_v54  ;;  %v1497_v3 = vmax.f32 %v801_v63, 0.0 }
 0x259   :  { %v986_v48 = vpop.f32.mrf.mxu0  ;;  %v810_v37 = vpop.f32.mrf.mxu1 }
 0x25a   :  { %v804_v4 = vadd.f32 %v803_v35, %v755_v62  ;;  %v819_v30 = vsel %vm129_vm2, %v1497_v3, 0.0  ;;  %v987_v42 = vadd.f32 %v986_v48, %v985_v2  ;;  %v836_v5 = vmul.f32 %v1497_v3, %v1497_v3 }
 0x25b   :  { %820 = vadd.xlane.f32.xlu0 %v819_v30  ;;  %v988_v9 = vpop.f32.mrf.mxu0  ;;  %v811_v29 = vpop.f32.mrf.mxu1  ;;  %v883_v48 = vrot.slane %v1493_v51, %v1384_v56 }
 0x25c   :  { %v760_v10 = vadd.f32 %v987_v42, %v560_v54  ;;  %v1503_v11 = vmax.f32 %v804_v4, 0.0  ;;  %v840_v12 = vsel %vm129_vm2, %v836_v5, 0.0  ;;  %v891_v42 = vrot.slane %v1493_v51, %v1391_v0 }
 0x25d   :  { %v989_v13 = vpop.f32.mrf.mxu0  ;;  %v813_v20 = vpop.f32.mrf.mxu1 }
 0x25e   :  { %v809_v16 = vadd.f32 %v808_v59, %v760_v10  ;;  %v822_v18 = vsel %vm129_vm2, %v1503_v11, 0.0  ;;  %v990_v19 = vadd.f32 %v989_v13, %v988_v9  ;;  %v837_v32 = vmul.f32 %v1503_v11, %v1503_v11 }
 0x25f   :  { %823 = vadd.xlane.f32.xlu1 %v822_v18  ;;  %841 = vadd.xlane.f32.xlu0 %v840_v12 }
 0x260   :  { %v763_v28 = vadd.f32 %v990_v19, %v560_v54  ;;  %v817_v33 = vmax.f32 %v809_v16, 0.0  ;;  %v843_v14 = vsel %vm129_vm2, %v837_v32, 0.0 }
 0x262   :  { %v812_v50 = vadd.f32 %v811_v29, %v763_v28  ;;  %v825_v15 = vsel %vm129_vm2, %v817_v33, 0.0  ;;  %v838_v34 = vmul.f32 %v817_v33, %v817_v33 }
 0x263   :  { %844 = vadd.xlane.f32.xlu1 %v843_v14  ;;  %826 = vadd.xlane.f32.xlu0 %v825_v15 }
 0x264   :  { %v818_v44 = vmax.f32 %v812_v50, 0.0  ;;  %v846_v46 = vsel %vm129_vm2, %v838_v34, 0.0 }
 0x266   :  { %v828_v45 = vsel %vm129_vm2, %v818_v44, 0.0  ;;  %v839_v61 = vmul.f32 %v818_v44, %v818_v44 }
 0x267   :  { %829 = vadd.xlane.f32.xlu1 %v828_v45  ;;  %847 = vadd.xlane.f32.xlu0 %v846_v46 }
 0x268   :  { %v849_v49 = vsel %vm129_vm2, %v839_v61, 0.0 }
 0x26b   :  { %850 = vadd.xlane.f32.xlu1 %v849_v49 }
 0x2e4   :  { %v821_v60 = vpop.xlane.xlu0 %820 }
 0x2e5   :  { %v832_v47 = vmul.f32 0.025641026, %v821_v60 }
 0x2e7   :  { %v856_v52 = vmul.f32 %v832_v47, %v832_v47  ;;  %v864_v4 = vsub.f32 %v1497_v3, %v832_v47 }
 0x2e8   :  { %v824_v6 = vpop.xlane.xlu1 %823  ;;  %v842_v17 = vpop.xlane.xlu0 %841 }
 0x2e9   :  { %v833_v53 = vmul.f32 0.025641026, %v824_v6  ;;  %v852_v8 = vmul.f32 0.025641026, %v842_v17 }
 0x2eb   :  { %v860_v24 = vsub.f32 %v852_v8, %v856_v52  ;;  %v857_v38 = vmul.f32 %v833_v53, %v833_v53  ;;  %v865_v5 = vsub.f32 %v1503_v11, %v833_v53 }
 0x2ec   :  { %v845_v39 = vpop.xlane.xlu1 %844  ;;  %v827_v27 = vpop.xlane.xlu0 %826 }
 0x2ed   :  { %v868_v57 = vadd.f32 1e-05, %v860_v24  ;;  %v853_v55 = vmul.f32 0.025641026, %v845_v39  ;;  %v834_v31 = vmul.f32 0.025641026, %v827_v27 }
 0x2ef   :  { %1045 = vrsqrt.f32 %v868_v57  ;;  %v861_v54 = vsub.f32 %v853_v55, %v857_v38  ;;  %v858_v43 = vmul.f32 %v834_v31, %v834_v31  ;;  %v866_v16 = vsub.f32 %v817_v33, %v834_v31 }
 0x2f0   :  { %v830_v58 = vpop.xlane.xlu1 %829  ;;  %v848_v7 = vpop.xlane.xlu0 %847 }
 0x2f1   :  { %v869_v36 = vadd.f32 1e-05, %v861_v54  ;;  %v835_v35 = vmul.f32 0.025641026, %v830_v58  ;;  %v854_v21 = vmul.f32 0.025641026, %v848_v7 }
 0x2f3   :  { %1047 = vrsqrt.f32 %v869_v36  ;;  %v862_v40 = vsub.f32 %v854_v21, %v858_v43  ;;  %v859_v63 = vmul.f32 %v835_v35, %v835_v35  ;;  %v867_v3 = vsub.f32 %v818_v44, %v835_v35 }
 0x2f4   :  { %v851_v41 = vpop.xlane.xlu1 %850 }
 0x2f5   :  { %v870_v1 = vadd.f32 1e-05, %v862_v40  ;;  %v855_v2 = vmul.f32 0.025641026, %v851_v41 }
 0x2f7   :  { %1049 = vrsqrt.f32 %v870_v1  ;;  %v863_v62 = vsub.f32 %v855_v2, %v859_v63 }
 0x2f9   :  { %v871_v59 = vadd.f32 1e-05, %v863_v62 }
 0x2fb   :  { %1051 = vrsqrt.f32 %v871_v59 }
 0x2fc   :  { %v1046_v30 = vpop.eup %1045 }
 0x2fd   :  { %v876_v37 = vmul.f32 %v1046_v30, %v864_v4 }
 0x2ff   :  { %v884_v9 = vmul.f32 %v883_v48, %v876_v37 }
 0x300   :  { %v1048_v10 = vpop.eup %1047 }
 0x301   :  { %v877_v29 = vmul.f32 %v1048_v10, %v865_v5  ;;  %v892_v12 = vadd.f32 %v891_v42, %v884_v9 }
 0x303   :  { %v885_v13 = vmul.f32 %v883_v48, %v877_v29  ;;  %v896_v18 = vadd.f32 %v892_v12, %v1146_v22 }
 0x304   :  { %v1050_v19 = vpop.eup %1049 }
 0x305   :  { %v878_v56 = vmul.f32 %v1050_v19, %v866_v16  ;;  %v893_v20 = vadd.f32 %v891_v42, %v885_v13  ;;  %900 = vst.msk [vmem:[#allocation2] sm:$0xff] %vm129_vm2, %v896_v18 }
 0x307   :  { %v886_v32 = vmul.f32 %v883_v48, %v878_v56  ;;  %v897_v0 = vadd.f32 %v893_v20, %v1151_v23 }
 0x308   :  { %v1052_v51 = vpop.eup %1051 }
 0x309   :  { %v879_v28 = vmul.f32 %v1052_v51, %v867_v3  ;;  %v894_v11 = vadd.f32 %v891_v42, %v886_v32  ;;  %901 = vst.msk [vmem:[#allocation2 + $0x8] sm:$0xff] %vm129_vm2, %v897_v0 }
 0x30b   :  { %v887_v50 = vmul.f32 %v883_v48, %v879_v28  ;;  %v898_v14 = vadd.f32 %v894_v11, %v1159_v25 }
 0x30d   :  { %v895_v22 = vadd.f32 %v891_v42, %v887_v50  ;;  %902 = vst.msk [vmem:[#allocation2 + $0x10] sm:$0xff] %vm129_vm2, %v898_v14 }
 0x30f   :  { %v899_v33 = vadd.f32 %v895_v22, %v1164_v26 }
 0x311   :  { %903 = vst.msk [vmem:[#allocation2 + $0x18] sm:$0xff] %vm129_vm2, %v899_v33 }
 0x312   :  { %1064 = shalt.err (!%p1061_p4)
}
 0x313   :  { %s1078_s20 = smov 128   ;;  %s1079_s21 = smov 8  }
 0x314   :  { %915 = dma.vmem_to_hbm [thread:$0]  %s910_s19, 512, %s1537_s5, [#allocation3], %s1078_s20, %s1078_s20, %s1079_s21  }
 0x315   :  { %1073 = dma.done.wait [#allocation3], 512  }
 0x316   :  { %1074 = vsyncadd [#allocation3], 4294966784 }
 0x317   :  { %919 = vsyncpa [#allocation3], 1 }

</bundles_post_ra>
